<compile_context>
chip_gen: v6e
topology: v6e:2x2x1
jax: 0.10.0
libtpu: 0.0.40
codegen_flags: <defaults>
</compile_context>

<pallas_src>
import jax
import jax.numpy as jnp
from jax.experimental import pallas as pl
from jax.experimental.pallas import tpu as pltpu


def _round_up(x, m):
    return (x + m - 1) // m * m


def _proto_dis_kernel(q_ref, pt_ref, psq_ref, o_ref):
    """q_ref:  (TQ, D_pad)      f32 VMEM   query tile
       pt_ref: (D_pad, WAY_PAD) f32 VMEM   prototypes, transposed, zero-padded
       psq_ref:(1, WAY_PAD)     f32 VMEM   ||proto||^2 per (padded) class
       o_ref:  (TQ, WAY_PAD)    f32 VMEM   -squared-distance tile (lane-dense)"""
    q = q_ref[...]                                                   # (TQ, D_pad)
    # Cross term on the MXU.
    cross = jnp.dot(q, pt_ref[...], preferred_element_type=jnp.float32)  # (TQ, WAY_PAD)
    # ||q||^2 : single lane reduction on the XLU.
    q_sq = jnp.sum(q * q, axis=-1, keepdims=True)                    # (TQ, 1)
    o_ref[...] = (2.0 * cross - q_sq - psq_ref[...]).astype(o_ref.dtype)


def prototype_metric(x1, x2, way_num=5, tq_max=256):
    """x1: (Q, C, H, W) query features, x2: (way*shot, C, H, W) support features.
    Returns (Q, way_num) negative squared Euclidean distances to class prototypes."""
    Q, C, H, W = x1.shape
    D = C * H * W
    S = x2.shape[0]
    assert S % way_num == 0, "support count must be way_num * shot_num"
    assert way_num <= 128, "way_num > 128 would need a way-tiled grid axis"
    shot = S // way_num

    q = x1.reshape(Q, D).astype(jnp.float32)                             # (Q, D)
    proto = x2.reshape(way_num, shot, D).astype(jnp.float32).mean(axis=1)  # (way, D)

    # --- lane-align the feature dim (zero cols are free for dots / norms) ---
    D_pad = _round_up(D, 128)
    if D_pad != D:
        q = jnp.pad(q, ((0, 0), (0, D_pad - D)))
        proto = jnp.pad(proto, ((0, 0), (0, D_pad - D)))

    # --- lane-dense output: pad prototype count to a full 128-lane tile ---
    WAY_PAD = 128
    proto_t = jnp.zeros((D_pad, WAY_PAD), jnp.float32).at[:, :way_num].set(proto.T)
    psq = jnp.zeros((1, WAY_PAD), jnp.float32).at[:, :way_num].set(
        jnp.sum(proto * proto, axis=-1)[None, :])

    # --- tile over Q so BlockSpec double-buffers the query DMA ---
    TQ = min(tq_max, _round_up(Q, 8))
    Q_pad = _round_up(Q, TQ)
    if Q_pad != Q:
        q = jnp.pad(q, ((0, Q_pad - Q), (0, 0)))

    out = pl.pallas_call(
        _proto_dis_kernel,
        out_shape=jax.ShapeDtypeStruct((Q_pad, WAY_PAD), jnp.float32),
        grid=(Q_pad // TQ,),
        in_specs=[
            pl.BlockSpec((TQ, D_pad), lambda i: (i, 0)),        # query tile
            pl.BlockSpec((D_pad, WAY_PAD), lambda i: (0, 0)),   # resident protos
            pl.BlockSpec((1, WAY_PAD), lambda i: (0, 0)),       # resident ||p||^2
        ],
        out_specs=pl.BlockSpec((TQ, WAY_PAD), lambda i: (i, 0)),
        compiler_params=pltpu.CompilerParams(
            dimension_semantics=("parallel",)),   # megacore split on v7x
    )(q, proto_t, psq)

    return out[:Q, :way_num]


if __name__ == "__main__":
    key = jax.random.PRNGKey(0)
    way_num, shot_num = 5, 5
    Q, C, H, W = 16, 8, 4, 4          # small shapes; D = C*H*W = 128

    k1, k2 = jax.random.split(key)
    x1 = jax.random.normal(k1, (Q, C, H, W), dtype=jnp.float32)
    x2 = jax.random.normal(k2, (way_num * shot_num, C, H, W), dtype=jnp.float32)

    out = prototype_metric(x1, x2, way_num=way_num)
    out = jax.block_until_ready(out)

    # Pure-JAX reference (mirrors the PyTorch math) for a correctness check.
    q_ref = x1.reshape(Q, -1)
    proto_ref = x2.reshape(way_num, shot_num, -1).mean(axis=1)
    ref = -((q_ref[:, None, :] - proto_ref[None, :, :]) ** 2).sum(-1)

    assert out.shape == (Q, way_num)
    assert jnp.allclose(out, ref, rtol=1e-4, atol=1e-3), "mismatch vs reference"

    print("KERNEL_OK")
</pallas_src>

<mosaic_0001>
module attributes {stable_mosaic.version = 11 : i64} {
  func.func @_proto_dis_kernel(%arg0: i32, %arg1: memref<16x128xf32, #tpu.memory_space<vmem>>, %arg2: memref<128x128xf32, #tpu.memory_space<vmem>>, %arg3: memref<1x128xf32, #tpu.memory_space<vmem>>, %arg4: memref<16x128xf32, #tpu.memory_space<vmem>>) attributes {dimension_semantics = [#tpu.dimension_semantics<parallel>], iteration_bounds = array<i64: 1>, scalar_prefetch = 0 : i64, scratch_operands = 0 : i64, tpu.core_type = #tpu.core_type<tc>, window_params = [{transform_indices = @transform_0, window_bounds = array<i64: 16, 128>}, {pipeline_mode = #tpu.pipeline_mode<synchronous>, transform_indices = @transform_1, window_bounds = array<i64: 128, 128>}, {pipeline_mode = #tpu.pipeline_mode<synchronous>, transform_indices = @transform_2, window_bounds = array<i64: 1, 128>}, {transform_indices = @transform_3, window_bounds = array<i64: 16, 128>}]} {
    %c0 = arith.constant 0 : index
    %c0_0 = arith.constant 0 : index
    %0 = vector.load %arg1[%c0, %c0_0] : memref<16x128xf32, #tpu.memory_space<vmem>>, vector<16x128xf32>
    %c0_1 = arith.constant 0 : index
    %c0_2 = arith.constant 0 : index
    %1 = vector.load %arg2[%c0_1, %c0_2] : memref<128x128xf32, #tpu.memory_space<vmem>>, vector<128x128xf32>
    %cst = arith.constant dense<0.000000e+00> : vector<16x128xf32>
    %2 = tpu.matmul %0, %1, %cst {dimension_numbers = #tpu.dot_dimension_numbers<[1], [0], [0], [1], [0, 0, 1, 1], [], []>} : vector<16x128xf32>, vector<128x128xf32>, vector<16x128xf32> -> vector<16x128xf32>
    %3 = arith.mulf %0, %0 : vector<16x128xf32>
    %cst_3 = arith.constant dense<0.000000e+00> : vector<16xf32>
    %4 = vector.multi_reduction <add>, %3, %cst_3 [1] : vector<16x128xf32> to vector<16xf32>
    %5 = vector.shape_cast %4 : vector<16xf32> to vector<16x1xf32>
    %cst_4 = arith.constant 2.000000e+00 : f32
    %6 = vector.broadcast %cst_4 : f32 to vector<16x128xf32>
    %7 = arith.mulf %6, %2 : vector<16x128xf32>
    %8 = vector.broadcast %5 : vector<16x1xf32> to vector<16x128xf32>
    %9 = arith.subf %7, %8 : vector<16x128xf32>
    %c0_5 = arith.constant 0 : index
    %c0_6 = arith.constant 0 : index
    %10 = vector.load %arg3[%c0_5, %c0_6] : memref<1x128xf32, #tpu.memory_space<vmem>>, vector<1x128xf32>
    %11 = vector.broadcast %10 : vector<1x128xf32> to vector<16x128xf32>
    %12 = arith.subf %9, %11 : vector<16x128xf32>
    %c0_7 = arith.constant 0 : index
    %c0_8 = arith.constant 0 : index
    %13 = vector.load %arg4[%c0_7, %c0_8] : memref<16x128xf32, #tpu.memory_space<vmem>>, vector<16x128xf32>
    tpu.vector_store %arg4[%c0_7, %c0_8], %12 {strides = array<i32>} : memref<16x128xf32, #tpu.memory_space<vmem>>, vector<16x128xf32>,
    return
  }
  func.func @transform_0(%arg0: i32) -> (i32, i32) {
    %c0_i32 = arith.constant 0 : i32
    %c0_i32_0 = arith.constant 0 : i32
    return %arg0, %c0_i32 : i32, i32
  }
  func.func @transform_1(%arg0: i32) -> (i32, i32) {
    %c0_i32 = arith.constant 0 : i32
    %c0_i32_0 = arith.constant 0 : i32
    %c0_i32_1 = arith.constant 0 : i32
    return %c0_i32, %c0_i32_0 : i32, i32
  }
  func.func @transform_2(%arg0: i32) -> (i32, i32) {
    %c0_i32 = arith.constant 0 : i32
    %c0_i32_0 = arith.constant 0 : i32
    %c0_i32_1 = arith.constant 0 : i32
    return %c0_i32, %c0_i32_0 : i32, i32
  }
  func.func @transform_3(%arg0: i32) -> (i32, i32) {
    %c0_i32 = arith.constant 0 : i32
    %c0_i32_0 = arith.constant 0 : i32
    return %arg0, %c0_i32 : i32, i32
  }
}

</mosaic_0001>

<bundles_post_ra>
// kernel: tpu_custom_call.1
= control target key start
LH: loop header
LB: loop body
LE: loop exit
PB: predicated region body
PF: predicated region fallthrough
CT: control target
= control target key end

     0   :  { %8 = vsyncpa [#allocation3], 0  ;;  %s346_s0 = inlined_call_operand.hbm [shape: f32[16,128], index: 0, kind: input, shape index: {}]   ;;  %s347_s1 = inlined_call_operand.hbm [shape: f32[128,128], index: 1, kind: input, shape index: {}]   ;;  %s348_s2 = inlined_call_operand.vmem [shape: f32[1,128], index: 2, kind: input, shape index: {}]   ;;  %s349_s3 = inlined_call_operand.hbm [shape: f32[16,128], index: 3, kind: output, shape index: {}]  }
   0x1   :  { %9 = vsyncpa [#allocation6], 0 }
   0x2   :  { %10 = vsyncpa [#allocation4], 0  ;;  %s300_s12 = smov [#allocation2]  }
   0x3   :  { %s16_s13 = sshll.u32 %s300_s12, 4  ;;  %s17_s13 = int_to_ptr.vmem [resolvable:$true] %s16_s13 }
   0x4   :  { %s242_s14 = scalar_lea.vmem %s17_s13, 256  ;;  %p247_p1 = scmp.lt.s32.totalorder %s17_s13, %s17_s13 }
   0x5   :  { %p243_p0 = scmp.ne.s32.totalorder %s17_s13, %s242_s14  ;;  %p248_p2 = scmp.lt.s32.totalorder %s242_s14, %s242_s14 }
   0x7   :  { %p249_p3 = por %p248_p2, %p247_p1 }
   0x9   :  { %p250_p4 = pnand %p249_p3, %p243_p0 }
   0xb   :  { %253 = shalt.err (!%p250_p4)
}
   0xc   :  { %s301_s15 = smov 128   ;;  %s302_s16 = smov 8  }
   0xd   :  { %22 = dma.hbm_to_vmem [thread:$0]  %s346_s0, 256, %s17_s13, [#allocation3], %s301_s15, %s301_s15, %s302_s16  }
   0xe   :  { %s303_s19 = smov [#allocation5]  }
   0xf   :  { %s28_s20 = sshll.u32 %s303_s19, 4  ;;  %s29_s20 = int_to_ptr.vmem [resolvable:$true] %s28_s20 }
  0x10   :  { %s262_s21 = scalar_lea.vmem %s29_s20, 2048  ;;  %p267_p6 = scmp.lt.s32.totalorder %s29_s20, %s29_s20 }
  0x11   :  { %p263_p5 = scmp.ne.s32.totalorder %s29_s20, %s262_s21  ;;  %p268_p7 = scmp.lt.s32.totalorder %s262_s21, %s262_s21 }
  0x13   :  { %p269_p8 = por %p268_p7, %p267_p6 }
  0x15   :  { %p270_p9 = pnand %p269_p8, %p263_p5 }
  0x17   :  { %273 = shalt.err (!%p270_p9)
}
  0x18   :  { %34 = dma.hbm_to_vmem [thread:$0]  %s347_s1, 2048, %s29_s20, [#allocation6], %s301_s15, %s301_s15, %s302_s16  }
  0x19   :  { %294 = dma.done.wait [#allocation3], 256  }
  0x1a   :  { %295 = vsyncadd [#allocation3], 4294967040 }
  0x1b   :  { %296 = dma.done.wait [#allocation6], 2048  }
  0x1c   :  { %297 = vsyncadd [#allocation6], 4294965248  ;;  %v60_v0 = vld [vmem:[#allocation5 + $0x78] sm:$0xff]  ;;  %v59_v1 = vld [vmem:[#allocation5 + $0x70] sm:$0xff]  ;;  %s304_s24 = smov [#allocation7]  }
  0x1d   :  { %194 = vmatprep.subr.mxu0 %v60_v0  ;;  %v58_v2 = vld [vmem:[#allocation5 + $0x68] sm:$0xff]  ;;  %v57_v3 = vld [vmem:[#allocation5 + $0x60] sm:$0xff]  ;;  %v43_v4 = vld [vmem:[#allocation2] sm:$0xff]  ;;  %s162_s25 = sshll.u32 %s304_s24, 4  ;;  %s163_s25 = int_to_ptr.vmem [resolvable:$true] %s162_s25 }
  0x1e   :  { %195 = vmatpush3.msra.mxu0 %v60_v0  ;;  %v56_v5 = vld [vmem:[#allocation5 + $0x58] sm:$0xff]  ;;  %226 = vmatprep.mubr.f32.mxu0 %v43_v4  ;;  %v136_v6 = vmul.f32 %v43_v4, %v43_v4  ;;  %v55_v8 = vld [vmem:[#allocation5 + $0x50] sm:$0xff]  ;;  %v54_v10 = vld [vmem:[#allocation5 + $0x48] sm:$0xff]  ;;  %s274_s26 = scalar_lea.vmem %s163_s25, 256  ;;  %p279_p11 = scmp.lt.s32.totalorder %s163_s25, %s163_s25 }
  0x1f   :  { %196 = vmatprep.subr.mxu0 %v59_v1  ;;  %v44_v7 = vld [vmem:[#allocation2 + $0x8] sm:$0xff]  ;;  %v53_v11 = vld [vmem:[#allocation5 + $0x40] sm:$0xff]  ;;  %v51_v13 = vld [vmem:[#allocation5 + $0x30] sm:$0xff]  ;;  %p275_p10 = scmp.ne.s32.totalorder %s163_s25, %s274_s26  ;;  %p280_p12 = scmp.lt.s32.totalorder %s274_s26, %s274_s26 }
  0x20   :  { %197 = vmatpush3.msra.mxu0 %v59_v1  ;;  %138 = vadd.xlane.f32.xlu0 %v136_v6  ;;  %v137_v9 = vmul.f32 %v44_v7, %v44_v7  ;;  %v52_v12 = vld [vmem:[#allocation5 + $0x38] sm:$0xff]  ;;  %v50_v14 = vld [vmem:[#allocation5 + $0x28] sm:$0xff]  ;;  %v49_v15 = vld [vmem:[#allocation5 + $0x20] sm:$0xff] }
  0x21   :  { %198 = vmatprep.subr.mxu0 %v58_v2  ;;  %v48_v16 = vld [vmem:[#allocation5 + $0x18] sm:$0xff]  ;;  %v47_v17 = vld [vmem:[#allocation5 + $0x10] sm:$0xff]  ;;  %v46_v18 = vld [vmem:[#allocation5 + $0x8] sm:$0xff]  ;;  %p281_p13 = por %p280_p12, %p279_p11 }
  0x22   :  { %199 = vmatpush3.msra.mxu0 %v58_v2  ;;  %v45_v19 = vld [vmem:[#allocation5] sm:$0xff]  ;;  %v175_v24 = vld [vmem:[%s348_s2] ss:$0 sm:$0xff] }
  0x23   :  { %200 = vmatprep.subr.mxu0 %v57_v3  ;;  %p282_p0 = pnand %p281_p13, %p275_p10 }
  0x24   :  { %201 = vmatpush3.msra.mxu0 %v57_v3  ;;  %140 = vadd.xlane.f32.xlu0 %v137_v9 }
  0x25   :  { %202 = vmatprep.subr.mxu0 %v56_v5 }
  0x26   :  { %203 = vmatpush3.msra.mxu0 %v56_v5 }
  0x27   :  { %204 = vmatprep.subr.mxu0 %v55_v8 }
  0x28   :  { %205 = vmatpush3.msra.mxu0 %v55_v8 }
  0x29   :  { %206 = vmatprep.subr.mxu0 %v54_v10 }
  0x2a   :  { %207 = vmatpush3.msra.mxu0 %v54_v10 }
  0x2b   :  { %208 = vmatprep.subr.mxu0 %v53_v11 }
  0x2c   :  { %209 = vmatpush3.msra.mxu0 %v53_v11 }
  0x2d   :  { %210 = vmatprep.subr.mxu0 %v52_v12 }
  0x2e   :  { %211 = vmatpush3.msra.mxu0 %v52_v12 }
  0x2f   :  { %212 = vmatprep.subr.mxu0 %v51_v13 }
  0x30   :  { %213 = vmatpush3.msra.mxu0 %v51_v13 }
  0x31   :  { %214 = vmatprep.subr.mxu0 %v50_v14 }
  0x32   :  { %215 = vmatpush3.msra.mxu0 %v50_v14 }
  0x33   :  { %216 = vmatprep.subr.mxu0 %v49_v15 }
  0x34   :  { %217 = vmatpush3.msra.mxu0 %v49_v15 }
  0x35   :  { %218 = vmatprep.subr.mxu0 %v48_v16 }
  0x36   :  { %219 = vmatpush3.msra.mxu0 %v48_v16 }
  0x37   :  { %220 = vmatprep.subr.mxu0 %v47_v17 }
  0x38   :  { %221 = vmatpush3.msra.mxu0 %v47_v17 }
  0x39   :  { %222 = vmatprep.subr.mxu0 %v46_v18 }
  0x3a   :  { %223 = vmatpush3.msra.mxu0 %v46_v18 }
  0x3b   :  { %224 = vmatprep.subr.mxu0 %v45_v19 }
  0x3c   :  { %225 = vmatpush3.msra.mxu0 %v45_v19 }
  0x3d   :  { %227 = vmatmul.mubr.f32.vlgmr.msra.gmra.mxu0 %v44_v7 }
  0xa9   :  { %v139_v20 = vpop.xlane.xlu0 %138 }
  0xad   :  { %v141_v22 = vpop.xlane.xlu0 %140 }
  0xfd   :  { %v228_v21 = vpop.f32.mrf.mxu0 }
  0xfe   :  { %v143_v23 = vmul.f32 2.0, %v228_v21 }
  0xff   :  { %v127_v25 = vpop.f32.mrf.mxu0 }
 0x100   :  { %v145_v26 = vsub.f32 %v143_v23, %v141_v22  ;;  %v142_v27 = vmul.f32 2.0, %v127_v25 }
 0x102   :  { %v154_v28 = vsub.f32 %v145_v26, %v175_v24  ;;  %v144_v29 = vsub.f32 %v142_v27, %v139_v20 }
 0x104   :  { %156 = vst [vmem:[#allocation7 + $0x8] sm:$0xff] %v154_v28  ;;  %v153_v30 = vsub.f32 %v144_v29, %v175_v24 }
 0x106   :  { %155 = vst [vmem:[#allocation7] sm:$0xff] %v153_v30 }
 0x107   :  { %285 = shalt.err (!%p282_p0)
}
 0x108   :  { %168 = dma.vmem_to_hbm [thread:$0]  %s163_s25, 256, %s349_s3, [#allocation4], %s301_s15, %s301_s15, %s302_s16  }
 0x109   :  { %298 = dma.done.wait [#allocation4], 256  }
 0x10a   :  { %299 = vsyncadd [#allocation4], 4294967040 }
 0x10b   :  { %172 = vsyncpa [#allocation3], 1 }
 0x10c   :  { %173 = vsyncpa [#allocation6], 1 }
 0x10d   :  { %174 = vsyncpa [#allocation4], 1 }

</bundles_post_ra>
